<compile_context>
chip_gen: v7x
topology: tpu7x:2x2x1
jax: 0.10.0
libtpu: 0.0.40
codegen_flags: <defaults>
</compile_context>

<pallas_src>
import functools

import jax
import jax.numpy as jnp
from jax.experimental import pallas as pl
from jax.experimental.pallas import tpu as pltpu


def _int_pow(x, n):
    """x**n for positive integer n via a multiply chain (VALU slots, no EUP)."""
    result = None
    base = x
    while n > 0:
        if n & 1:
            result = base if result is None else result * base
        n >>= 1
        if n:
            base = base * base
    return result


def _gem_kernel(x_ref, o_ref, acc_ref, *, p, inv_p, inv_hw, eps, acc_width):
    # x_ref: (TS, HWT) input block; o_ref: (TS, 1); acc_ref: (TS, acc_width) f32.
    k = pl.program_id(1)

    @pl.when(k == 0)
    def _():
        acc_ref[...] = jnp.zeros_like(acc_ref)

    x = jnp.maximum(x_ref[...].astype(jnp.float32), eps)   # clamp(min=eps) > 0

    p_int = int(round(p))
    if abs(p - float(p_int)) < 1e-12 and p_int >= 1:
        xp = _int_pow(x, p_int)                             # multiply chain (VALU)
    else:
        xp = jnp.power(x, p)                                # EUP fallback, non-int p

    if acc_width == 1:
        # Spatial tile not a multiple of 128 (masked lanes) -> plain lane reduce.
        acc_ref[...] += jnp.sum(xp, axis=-1, keepdims=True)
    else:
        # Deferred cross-lane reduce: per-step work is only lane-aligned
        # cross-vreg VALU adds into a (TS, 128) accumulator.
        hwt = xp.shape[-1]
        acc = acc_ref[...]
        for c in range(hwt // acc_width):
            acc = acc + xp[:, c * acc_width:(c + 1) * acc_width]
        acc_ref[...] = acc

    @pl.when(k == pl.num_programs(1) - 1)
    def _():
        total = acc_ref[...]
        if acc_width > 1:
            total = jnp.sum(total, axis=-1, keepdims=True)  # single XLU reduce
        m = total * inv_hw                                  # mean over H*W
        o_ref[...] = jnp.power(m, inv_p).astype(o_ref.dtype)


def _vmem_capacity_bytes():
    """Physical VMEM per TensorCore; conservative 64 MiB (v7x) if unknown."""
    try:
        info = pltpu.get_tpu_info()
        cap = int(getattr(info, "vmem_capacity_bytes", 0) or 0)
        if cap > 0:
            return cap
    except Exception:
        pass
    return 64 * 1024 * 1024


def _divisors(n):
    out = set()
    i = 1
    while i * i <= n:
        if n % i == 0:
            out.add(i)
            out.add(n // i)
        i += 1
    return sorted(out)


def _choose_tiles(nrows, hw, itemsize, buf_budget):
    """Pick (row_tile, hw_tile) so one input tile fits `buf_budget` bytes.

    Layout rules: hw_tile is a multiple of 128 or the full extent; row_tile is
    a multiple of 8 or the full extent; both divide their axes exactly.
    Prefers the full spatial extent (fewest reduction steps), then grows the
    row tile, and keeps >= 2 row blocks when possible (v7x has 2 TensorCores).
    """
    # --- spatial tile -------------------------------------------------------
    min_rows = min(8, nrows)
    row_budget_elems = max(1, buf_budget // (min_rows * itemsize))
    if hw <= row_budget_elems:
        hwt = hw
    elif hw % 128 == 0:
        hwt = 128
        t = (row_budget_elems // 128) * 128
        while t >= 128:
            if hw % t == 0:
                hwt = t
                break
            t -= 128
    else:
        # A non-multiple-of-128 spatial axis cannot be tiled (layout rule):
        # use the full extent and let the row tile absorb the budget.
        hwt = hw

    # --- row tile -----------------------------------------------------------
    legal = [d for d in _divisors(nrows) if d % 8 == 0 or d == nrows]
    max_ts = max(1, buf_budget // (hwt * itemsize))
    fitting = [d for d in legal if d <= max_ts] or [min(legal)]
    ts = max(fitting)
    if nrows // ts < 2:                       # keep both v7x cores busy
        two_blocks = [d for d in fitting if nrows // d >= 2]
        if two_blocks:
            ts = max(two_blocks)
    return ts, hwt


def gem_pool(x, p=3.0, eps=1e-6, hw_tile=None, row_tile=None):
    """GeneralizedMeanPooling with output_size=1 (the fastreid default)."""
    B, C, H, W = x.shape
    HW = H * W
    NR = B * C
    xr = x.reshape(NR, HW)                      # free reshape (contiguous)
    itemsize = jnp.dtype(x.dtype).itemsize

    # Generation-aware VMEM budgeting.
    cap = _vmem_capacity_bytes()
    limit_cap = max(4 * 1024 * 1024, cap - 8 * 1024 * 1024)   # physical - headroom
    buf_budget = (4 * 1024 * 1024) if cap <= 64 * 1024 * 1024 else (8 * 1024 * 1024)

    auto_ts, auto_hwt = _choose_tiles(NR, HW, itemsize, buf_budget)
    HWT = int(hw_tile) if hw_tile is not None else auto_hwt
    TS = int(row_tile) if row_tile is not None else auto_ts

    assert HW % HWT == 0 and (HWT % 128 == 0 or HWT == HW), (
        f"hw_tile={HWT} must divide HW={HW} and be a multiple of 128 or full")
    assert NR % TS == 0 and (TS % 8 == 0 or TS == NR), (
        f"row_tile={TS} must divide B*C={NR} and be a multiple of 8 or full")

    acc_width = 128 if HWT % 128 == 0 else 1

    # VMEM check: double-buffered input tile + output + accumulator + headroom.
    tile_bytes = TS * HWT * itemsize
    needed = 2 * tile_bytes + 2 * TS * itemsize + TS * acc_width * 4 + (1 << 20)
    assert needed <= limit_cap, (
        f"VMEM budget exceeded: need ~{needed} bytes, limit {limit_cap}; "
        f"pass smaller hw_tile/row_tile")
    vmem_limit = int(min(limit_cap, max(needed, 4 * 1024 * 1024)))

    p = float(p)
    p_int = int(round(p))
    p_is_int = abs(p - p_int) < 1e-12 and p_int >= 1
    n_elems = NR * HW
    cost = pl.CostEstimate(
        flops=4 * n_elems + 2 * NR,
        transcendentals=NR + (0 if p_is_int else n_elems),
        bytes_accessed=n_elems * itemsize + NR * itemsize,
    )

    out = pl.pallas_call(
        functools.partial(
            _gem_kernel,
            p=p,
            inv_p=1.0 / p,
            inv_hw=1.0 / float(HW),
            eps=float(eps),
            acc_width=acc_width,
        ),
        out_shape=jax.ShapeDtypeStruct((NR, 1), x.dtype),
        grid=(NR // TS, HW // HWT),              # reduction axis last
        in_specs=[pl.BlockSpec((TS, HWT), lambda r, k: (r, k))],
        out_specs=pl.BlockSpec((TS, 1), lambda r, k: (r, 0)),
        scratch_shapes=[pltpu.VMEM((TS, acc_width), jnp.float32)],
        compiler_params=pltpu.CompilerParams(
            dimension_semantics=("parallel", "arbitrary"),
            vmem_limit_bytes=vmem_limit,
        ),
        cost_estimate=cost,
    )(xr)
    return out.reshape(B, C, 1, 1)


def gem_pool_ref(x, p=3.0, eps=1e-6):
    """Pure-JAX reference matching the PyTorch forward."""
    xc = jnp.maximum(x.astype(jnp.float32), eps) ** p
    m = jnp.mean(xc, axis=(2, 3), keepdims=True)
    return (m ** (1.0 / p)).astype(x.dtype)


if __name__ == "__main__":
    # Module "parameters": self.p = 3.0, self.eps = 1e-6, output_size = 1.
    norm_p = 3.0
    eps = 1e-6

    k0, k1 = jax.random.split(jax.random.PRNGKey(0))
    x = jax.random.normal(k0, (2, 4, 16, 16), dtype=jnp.float32)

    # Default path (full spatial extent in one step, (TS,128) accumulator).
    out = jax.block_until_ready(gem_pool(x, p=norm_p, eps=eps))
    ref = gem_pool_ref(x, p=norm_p, eps=eps)
    assert out.shape == (2, 4, 1, 1), out.shape
    assert jnp.allclose(out, ref, atol=1e-5, rtol=1e-5), (
        f"max err {jnp.max(jnp.abs(out - ref))}")

    # Force the multi-step reduction path: H*W=256 split into 2 tiles of 128.
    out_tiled = jax.block_until_ready(gem_pool(x, p=norm_p, eps=eps, hw_tile=128))
    assert jnp.allclose(out_tiled, ref, atol=1e-5, rtol=1e-5), (
        f"max err (tiled) {jnp.max(jnp.abs(out_tiled - ref))}")

    # Realistic non-multiple-of-128 feature map (7x7) -> (TS, 1) accumulator path.
    x2 = jax.random.normal(k1, (2, 4, 7, 7), dtype=jnp.float32)
    out2 = jax.block_until_ready(gem_pool(x2, p=norm_p, eps=eps))
    ref2 = gem_pool_ref(x2, p=norm_p, eps=eps)
    assert jnp.allclose(out2, ref2, atol=1e-5, rtol=1e-5), (
        f"max err (7x7) {jnp.max(jnp.abs(out2 - ref2))}")

    # Non-integer p exercises the jnp.power fallback.
    out_frac = jax.block_until_ready(gem_pool(x, p=2.5, eps=eps))
    ref_frac = gem_pool_ref(x, p=2.5, eps=eps)
    assert jnp.allclose(out_frac, ref_frac, atol=1e-5, rtol=1e-5), (
        f"max err (p=2.5) {jnp.max(jnp.abs(out_frac - ref_frac))}")

    print("KERNEL_OK")
</pallas_src>

<mosaic_0001>
module attributes {stable_mosaic.version = 11 : i64} {
  func.func @_gem_kernel(%arg0: i32, %arg1: i32, %arg2: memref<8x256xf32, #tpu.memory_space<vmem>>, %arg3: memref<8x1xf32, #tpu.memory_space<vmem>>, %arg4: memref<8x128xf32, #tpu.memory_space<vmem>>) attributes {dimension_semantics = [#tpu.dimension_semantics<parallel>, #tpu.dimension_semantics<arbitrary>], iteration_bounds = array<i64: 1, 1>, scalar_prefetch = 0 : i64, scratch_operands = 1 : i64, tpu.core_type = #tpu.core_type<tc>, window_params = [{transform_indices = @transform_0, window_bounds = array<i64: 8, 256>}, {transform_indices = @transform_1, window_bounds = array<i64: 8, 1>}]} {
    %c0_i32 = arith.constant 0 : i32
    %0 = arith.cmpi eq, %arg1, %c0_i32 : i32
    %1 = arith.extui %0 : i1 to i32
    %c0_i32_0 = arith.constant 0 : i32
    %2 = arith.cmpi ne, %1, %c0_i32_0 : i32
    scf.if %2 {
      %cst_8 = arith.constant 0.000000e+00 : f32
      %17 = vector.broadcast %cst_8 : f32 to vector<8x128xf32>
      %c0_9 = arith.constant 0 : index
      %c0_10 = arith.constant 0 : index
      %18 = vector.load %arg4[%c0_9, %c0_10] : memref<8x128xf32, #tpu.memory_space<vmem>>, vector<8x128xf32>
      tpu.vector_store %arg4[%c0_9, %c0_10], %17 {strides = array<i32>} : memref<8x128xf32, #tpu.memory_space<vmem>>, vector<8x128xf32>,
    } else {
    }
    %c0 = arith.constant 0 : index
    %c0_1 = arith.constant 0 : index
    %3 = vector.load %arg2[%c0, %c0_1] : memref<8x256xf32, #tpu.memory_space<vmem>>, vector<8x256xf32>
    %cst = arith.constant 9.99999997E-7 : f32
    %4 = vector.broadcast %cst : f32 to vector<8x256xf32>
    %5 = arith.maximumf %3, %4 : vector<8x256xf32>
    %6 = arith.mulf %5, %5 : vector<8x256xf32>
    %7 = arith.mulf %5, %6 : vector<8x256xf32>
    %c0_2 = arith.constant 0 : index
    %c0_3 = arith.constant 0 : index
    %8 = vector.load %arg4[%c0_2, %c0_3] : memref<8x128xf32, #tpu.memory_space<vmem>>, vector<8x128xf32>
    %9 = vector.extract_strided_slice %7 {offsets = [0, 0], sizes = [8, 128], strides = [1, 1]} : vector<8x256xf32> to vector<8x128xf32>
    %10 = arith.addf %8, %9 : vector<8x128xf32>
    %11 = vector.extract_strided_slice %7 {offsets = [0, 128], sizes = [8, 128], strides = [1, 1]} : vector<8x256xf32> to vector<8x128xf32>
    %12 = arith.addf %10, %11 : vector<8x128xf32>
    %c0_4 = arith.constant 0 : index
    %c0_5 = arith.constant 0 : index
    %13 = vector.load %arg4[%c0_4, %c0_5] : memref<8x128xf32, #tpu.memory_space<vmem>>, vector<8x128xf32>
    tpu.vector_store %arg4[%c0_4, %c0_5], %12 {strides = array<i32>} : memref<8x128xf32, #tpu.memory_space<vmem>>, vector<8x128xf32>,
    %c0_i32_6 = arith.constant 0 : i32
    %14 = arith.cmpi eq, %arg1, %c0_i32_6 : i32
    %15 = arith.extui %14 : i1 to i32
    %c0_i32_7 = arith.constant 0 : i32
    %16 = arith.cmpi ne, %15, %c0_i32_7 : i32
    scf.if %16 {
      %c0_8 = arith.constant 0 : index
      %c0_9 = arith.constant 0 : index
      %17 = vector.load %arg4[%c0_8, %c0_9] : memref<8x128xf32, #tpu.memory_space<vmem>>, vector<8x128xf32>
      %cst_10 = arith.constant dense<0.000000e+00> : vector<8xf32>
      %18 = vector.multi_reduction <add>, %17, %cst_10 [1] : vector<8x128xf32> to vector<8xf32>
      %19 = vector.shape_cast %18 : vector<8xf32> to vector<8x1xf32>
      %cst_11 = arith.constant 3.906250e-03 : f32
      %20 = vector.broadcast %cst_11 : f32 to vector<8x1xf32>
      %21 = arith.mulf %19, %20 : vector<8x1xf32>
      %cst_12 = arith.constant 0.333333343 : f32
      %22 = vector.broadcast %cst_12 : f32 to vector<8x1xf32>
      %23 = math.powf %21, %22 : vector<8x1xf32>
      %c0_13 = arith.constant 0 : index
      %c0_14 = arith.constant 0 : index
      %24 = vector.load %arg3[%c0_13, %c0_14] : memref<8x1xf32, #tpu.memory_space<vmem>>, vector<8x1xf32>
      tpu.vector_store %arg3[%c0_13, %c0_14], %23 {strides = array<i32>} : memref<8x1xf32, #tpu.memory_space<vmem>>, vector<8x1xf32>,
    } else {
    }
    return
  }
  func.func @transform_0(%arg0: i32, %arg1: i32) -> (i32, i32) {
    %c0_i32 = arith.constant 0 : i32
    return %arg0, %arg1 : i32, i32
  }
  func.func @transform_1(%arg0: i32, %arg1: i32) -> (i32, i32) {
    %c0_i32 = arith.constant 0 : i32
    %c0_i32_0 = arith.constant 0 : i32
    return %arg0, %c0_i32 : i32, i32
  }
}

</mosaic_0001>

<bundles_post_ra>
// kernel: tpu_custom_call.1
= control target key start
LH: loop header
LB: loop body
LE: loop exit
PB: predicated region body
PF: predicated region fallthrough
CT: control target
= control target key end

     0   :  { %6 = vsyncpa [#allocation4], 0  ;;  %s99_s6 = smov [#allocation3]   ;;  %s125_s0 = inlined_call_operand.hbm [shape: f32[8,256], index: 0, kind: input, shape index: {}]   ;;  %s126_s1 = inlined_call_operand.vmem [shape: f32[8,1], index: 1, kind: output, shape index: {}]  }
   0x1   :  { %s13_s7 = sshll.u32 %s99_s6, 4  ;;  %s75_s10 = scalar_lea.hbm %s125_s0, 256  ;;  %s14_s7 = int_to_ptr.vmem [resolvable:$true] %s13_s7 }
   0x2   :  { %p76_p0 = scmp.ne.s32.totalorder %s125_s0, %s75_s10  ;;  %p79_p1 = scmp.lt.u32.totalorder %s75_s10, %s125_s0 }
   0x4   :  { %p81_p2 = pnand %p79_p1, %p76_p0 }
   0x6   :  { %84 = shalt.err (!%p81_p2)
}
   0x7   :  { %s85_s15 = scalar_lea.vmem %s14_s7, 256  ;;  %p90_p4 = scmp.lt.s32.totalorder %s14_s7, %s14_s7 }
   0x8   :  { %p86_p3 = scmp.ne.s32.totalorder %s14_s7, %s85_s15  ;;  %p91_p5 = scmp.lt.s32.totalorder %s85_s15, %s85_s15 }
   0xa   :  { %p92_p6 = por %p91_p5, %p90_p4 }
   0xc   :  { %p93_p7 = pnand %p92_p6, %p86_p3 }
   0xe   :  { %96 = shalt.err (!%p93_p7)
}
   0xf   :  { %16 = dma.hbm_to_vmem [thread:$0]  %s125_s0, 256, %s14_s7, [#allocation4]  }
  0x10   :  { %97 = dma.done.wait [#allocation4], 256  }
  0x11   :  { %98 = vsyncadd [#allocation4], 4294967040  ;;  %v25_v0 = vld [vmem:[#allocation3] sm:$0xff]  ;;  %v26_v1 = vld [vmem:[#allocation3 + $0x8] sm:$0xff]  ;;  %vm45_vm4 = vcmask 7168  }
  0x12   :  { %v27_v2 = vmax.f32 %v25_v0, 1e-06  ;;  %v28_v3 = vmax.f32 %v26_v1, 1e-06 }
  0x14   :  { %v29_v4 = vmul.f32 %v27_v2, %v27_v2  ;;  %v30_v5 = vmul.f32 %v28_v3, %v28_v3 }
  0x16   :  { %v31_v6 = vmul.f32 %v29_v4, %v27_v2  ;;  %v32_v7 = vmul.f32 %v30_v5, %v28_v3 }
  0x18   :  { %v35_v8 = vadd.f32 %v32_v7, %v31_v6 }
  0x1a   :  { %41 = vadd.xlane.f32.xlu0 %v35_v8 }
  0xa7   :  { %v42_v9 = vpop.xlane.xlu0 %41 }
  0xa8   :  { %v43_v10 = vmul.f32 0.00390625, %v42_v9 }
  0xaa   :  { %v54_v11 = vand.u32 2147483647, %v43_v10  ;;  %v58_v14 = vand.u32 2147483648, %v43_v10  ;;  %vm53_vm2 = vcmp.lt.f32.partialorder %v43_v10, 0.0  ;;  %vm52_vm3 = vcmp.eq.f32.partialorder %v43_v10, 0.0 }
  0xac   :  { %71 = vlog2.f32 %v54_v11  ;;  %vm62_vm0 = vweird.f32 %v54_v11  ;;  %vm64_vm1 = vcmp.eq.f32.partialorder %v54_v11, 0.0  ;;  %vm55_vm5 = vcmp.eq.f32.partialorder %v54_v11, inf }
  0xb6   :  { %v72_v12 = vpop.eup %71 }
  0xb7   :  { %v59_v13 = vmul.f32 0.33333334, %v72_v12 }
  0xb9   :  { %73 = vpow2.f32 %v59_v13 }
  0xc3   :  { %v74_v15 = vpop.eup %73 }
  0xc4   :  { %v61_v16 = vor.u32 %v74_v15, %v58_v14 }
  0xc6   :  { %v63_v17 = vsel %vm62_vm0, %v43_v10, %v61_v16 }
  0xc7   :  { %v66_v18 = vsel %vm64_vm1, %v58_v14, %v63_v17 }
  0xc8   :  { %v67_v19 = vsel %vm53_vm2, nan, %v66_v18 }
  0xc9   :  { %v68_v20 = vsel %vm52_vm3, 0.0, %v67_v19 }
  0xca   :  { %v69_v21 = vsel %vm55_vm5, inf, %v68_v20 }
  0xcb   :  { %46 = vst.msk [vmem:[%s126_s1] sm:$0xff] %vm45_vm4, %v69_v21 }
  0xcc   :  { %51 = vsyncpa [#allocation4], 1 }

</bundles_post_ra>
